<compile_context>
chip_gen: v5e
topology: v5e:2x2
jax: 0.10.0
libtpu: 0.0.40
codegen_flags: <defaults>
</compile_context>

<pallas_src>
import functools
import math

import jax
import jax.numpy as jnp
from jax import lax
from jax.experimental import pallas as pl
from jax.experimental.pallas import tpu as pltpu


def _round_up(v: int, m: int) -> int:
    return -(-v // m) * m


def _interp_matrix(in_size: int, out_size: int, mode: str) -> jnp.ndarray:
    """(out_size, in_size) interpolation matrix, PyTorch align_corners=False rule."""
    scale = in_size / out_size
    if mode == "nearest":
        src = jnp.floor(jnp.arange(out_size, dtype=jnp.float32) * scale).astype(jnp.int32)
        src = jnp.clip(src, 0, in_size - 1)
        return jax.nn.one_hot(src, in_size, dtype=jnp.float32)
    elif mode in ("bilinear", "linear"):
        src = (jnp.arange(out_size, dtype=jnp.float32) + 0.5) * scale - 0.5
        src = jnp.maximum(src, 0.0)
        i0 = jnp.clip(jnp.floor(src).astype(jnp.int32), 0, in_size - 1)
        i1 = jnp.minimum(i0 + 1, in_size - 1)
        w1 = src - i0.astype(jnp.float32)
        w0 = 1.0 - w1
        return (jax.nn.one_hot(i0, in_size, dtype=jnp.float32) * w0[:, None]
                + jax.nn.one_hot(i1, in_size, dtype=jnp.float32) * w1[:, None])
    # TODO(synk): 'bicubic' / 'area' modes not implemented (cubic needs a 4-tap matrix).
    raise NotImplementedError(f"mode={mode}")


def _vmem_caps():
    """Per-generation (budget, vmem_limit) in bytes, from the hardware query."""
    vmem_phys = 0
    try:
        info = pltpu.get_tpu_info()
        vmem_phys = int(getattr(info, "vmem_capacity_bytes", 0) or 0)
    except Exception:
        vmem_phys = 0
    if vmem_phys <= 0:
        vmem_phys = 64 * 1024 * 1024        # assume the smallest per-core VMEM (v7x)
    # v5e/v6e (128 MiB): budget 48 MiB / limit 96 MiB.  v7x (64 MiB): 35 / 48 MiB.
    budget = min(int(vmem_phys * 0.55), 48 * 1024 * 1024)
    limit = min(int(vmem_phys * 0.75), 96 * 1024 * 1024)
    return budget, limit


def _pick_batch(nc, h_in_p, w_in, h_out, w_out_p, itemsize, sub, budget):
    """Channel planes per grid step, sized against a (8,128)-padding-aware budget."""
    lane = 128

    def footprint(b):
        bw = _round_up(b * w_out_p, lane)
        x_tile = 2 * b * h_in_p * _round_up(w_in, lane) * itemsize            # dbl-buffered in
        o_tile = 2 * _round_up(h_out, sub) * bw * itemsize                     # dbl-buffered out
        w_tile = 2 * (_round_up(h_out, sub) * _round_up(h_in_p, lane)
                      + _round_up(w_in, sub) * _round_up(w_out_p, lane)) * itemsize
        inter = (b * h_in_p * _round_up(w_in, lane) * itemsize                 # loaded x copy
                 + b * h_in_p * _round_up(w_out_p, lane) * 4                   # width-resize f32
                 + b * w_out_p * _round_up(h_in_p, lane) * 4                   # lane-folded copy
                 + _round_up(h_out, sub) * bw * 4)                             # height-resize f32
        return x_tile + o_tile + w_tile + inter

    # 1) largest B that fits the budget
    b = 1
    while 2 * b <= nc and footprint(2 * b) <= budget:
        b *= 2
    while b < nc and footprint(b + 1) <= budget:
        b += 1
    # 2) keep >= 2 grid steps per TensorCore (v7x shards the parallel axis over 2 TCs)
    if nc >= 4:
        b = min(b, nc // 4)
    elif nc >= 2:
        b = min(b, max(1, nc // 2))
    # 3) prefer a folded output width that is a whole number of 128-lane vregs
    q = lane // math.gcd(w_out_p, lane)
    if b > q:
        b = (b // q) * q
    return max(1, min(b, nc))


def _make_interp_kernel(batch, h_in_p, w_in, h_out, w_out_p, precision):
    def kernel(x_ref, wh_ref, wwt_ref, o_ref):
        # x_ref:   (B, H_in_p, W_in)
        # wh_ref:  (H_out, H_in_p)
        # wwt_ref: (W_in, W_out_p)
        # o_ref:   (H_out, B * W_out_p)   lane-dense output slab
        cdt = x_ref.dtype
        # (B, H_in_p) -> B*H_in_p merge is a layout no-op: H_in_p % sublane-tile == 0.
        x2 = x_ref[...].reshape(batch * h_in_p, w_in)
        # Width resize: ONE slab matmul, M = B*H_in_p, K = W_in, N = W_out_p.
        t = jnp.dot(x2, wwt_ref[...], precision=precision,
                    preferred_element_type=jnp.float32)            # (B*H_in_p, W_out_p)
        # Fold the channel batch toward the lane axis using only tile-aligned
        # reshapes + a batched last-two-dims transpose (lowerable on TPU).
        t = t.reshape(batch, h_in_p, w_out_p)                      # layout no-op split
        t = jnp.swapaxes(t, 1, 2)                                  # (B, W_out_p, H_in_p), XLU
        t = t.reshape(batch * w_out_p, h_in_p)                     # layout no-op merge
        # NOTE: for bf16 inputs this cast adds one extra rounding vs torch's
        # single-pass bilinear (kept for native-rate MXU); f32 path is unaffected.
        t = t.astype(cdt)
        # Height resize: ONE slab matmul (K on the rhs minor axis):
        #   (H_out, H_in_p) . (B*W_out_p, H_in_p)^T -> (H_out, B*W_out_p)
        # The result is already in the lane-dense output layout -> unmasked stores.
        o = lax.dot_general(wh_ref[...], t,
                            dimension_numbers=(((1,), (1,)), ((), ())),
                            precision=precision,
                            preferred_element_type=jnp.float32)
        o_ref[...] = o.astype(o_ref.dtype)
    return kernel


def interpolate(x, size, mode="bilinear"):
    """Pallas equivalent of Interpolate(size, mode)(x) for NCHW float input."""
    N, C, H_in, W_in = x.shape
    H_out, W_out = size
    NC = N * C

    itemsize = jnp.dtype(x.dtype).itemsize
    sub = 8 if itemsize >= 4 else (16 if itemsize == 2 else 32)    # sublane tile
    H_in_p = _round_up(H_in, sub)       # so the in-kernel (B,H_in)->(B*H_in) merge is a view
    W_out_p = _round_up(W_out, sub)     # so the in-kernel (B,W_out)->(B*W_out) merge is a view

    # Weights in bf16 only when activations are bf16 (MXU native rate);
    # accumulation is always f32 via preferred_element_type.
    wdtype = jnp.bfloat16 if x.dtype == jnp.bfloat16 else jnp.float32
    wh = _interp_matrix(H_in, H_out, mode).astype(wdtype)          # (H_out, H_in)
    if H_in_p != H_in:                                             # zero taps for padded rows
        wh = jnp.pad(wh, ((0, 0), (0, H_in_p - H_in)))
    wwt = _interp_matrix(W_in, W_out, mode).T.astype(wdtype)       # (W_in, W_out), host-side T
    if W_out_p != W_out:                                           # zero padded output columns
        wwt = jnp.pad(wwt, ((0, 0), (0, W_out_p - W_out)))

    budget, vmem_limit = _vmem_caps()
    B = _pick_batch(NC, H_in_p, W_in, H_out, W_out_p, itemsize, sub, budget)
    num_blocks = pl.cdiv(NC, B)

    xf = x.reshape(NC, H_in, W_in)
    pad_c = num_blocks * B - NC
    pad_h = H_in_p - H_in
    if pad_c or pad_h:
        xf = jnp.pad(xf, ((0, pad_c), (0, pad_h), (0, 0)))

    precision = lax.Precision.HIGHEST if wdtype == jnp.float32 else None
    kernel = _make_interp_kernel(B, H_in_p, W_in, H_out, W_out_p, precision)

    planes = num_blocks * B
    flops = 2 * planes * H_in_p * W_out_p * (W_in + H_out)
    bytes_accessed = ((xf.size + num_blocks * H_out * B * W_out_p) * itemsize
                      + (wh.size + wwt.size) * jnp.dtype(wdtype).itemsize)

    out = pl.pallas_call(
        kernel,
        out_shape=jax.ShapeDtypeStruct((num_blocks, H_out, B * W_out_p), x.dtype),
        grid_spec=pltpu.PrefetchScalarGridSpec(
            num_scalar_prefetch=0,
            grid=(num_blocks,),
            in_specs=[
                pl.BlockSpec((B, H_in_p, W_in), lambda i: (i, 0, 0)),
                # Constant index_map -> these tiles are only DMA'd on the first step.
                pl.BlockSpec((H_out, H_in_p), lambda i: (0, 0)),
                pl.BlockSpec((W_in, W_out_p), lambda i: (0, 0)),
            ],
            out_specs=pl.BlockSpec((None, H_out, B * W_out_p), lambda i: (i, 0, 0)),
        ),
        compiler_params=pltpu.CompilerParams(
            dimension_semantics=("parallel",),
            vmem_limit_bytes=vmem_limit,
        ),
        cost_estimate=pl.CostEstimate(flops=int(flops), transcendentals=0,
                                      bytes_accessed=int(bytes_accessed)),
    )(xf, wh, wwt)

    # Un-fold the lane-dense (H_out, B*W_out_p) slabs back to NCHW (layout plumbing).
    out = (out.reshape(num_blocks, H_out, B, W_out_p)
              .transpose(0, 2, 1, 3)[..., :W_out]
              .reshape(num_blocks * B, H_out, W_out))
    if pad_c:
        out = out[:NC]
    return out.reshape(N, C, H_out, W_out)


def _ref_bilinear(x, size):
    """Pure-JAX gather reference of torch bilinear w/ align_corners=False."""
    N, C, H, W = x.shape
    Ho, Wo = size
    sy, sx = H / Ho, W / Wo
    ys = jnp.maximum((jnp.arange(Ho, dtype=jnp.float32) + 0.5) * sy - 0.5, 0.0)
    xs = jnp.maximum((jnp.arange(Wo, dtype=jnp.float32) + 0.5) * sx - 0.5, 0.0)
    y0 = jnp.clip(jnp.floor(ys).astype(jnp.int32), 0, H - 1)
    x0 = jnp.clip(jnp.floor(xs).astype(jnp.int32), 0, W - 1)
    y1 = jnp.minimum(y0 + 1, H - 1)
    x1 = jnp.minimum(x0 + 1, W - 1)
    wy1 = (ys - y0.astype(jnp.float32))[:, None]
    wx1 = (xs - x0.astype(jnp.float32))[None, :]
    wy0, wx0 = 1.0 - wy1, 1.0 - wx1
    g = lambda yi, xi: x[:, :, yi[:, None], xi[None, :]]
    return (wy0 * wx0 * g(y0, x0) + wy0 * wx1 * g(y0, x1)
            + wy1 * wx0 * g(y1, x0) + wy1 * wx1 * g(y1, x1))


if __name__ == "__main__":
    key = jax.random.PRNGKey(0)
    N, C, H, W = 2, 4, 16, 16
    size = (32, 32)           # Interpolate(size=(32, 32), mode='bilinear')
    mode = "bilinear"

    x = jax.random.normal(key, (N, C, H, W), dtype=jnp.float32)

    interp = jax.jit(functools.partial(interpolate, size=size, mode=mode))
    y = jax.block_until_ready(interp(x))

    y_ref = _ref_bilinear(x, size)
    assert y.shape == (N, C, size[0], size[1]), y.shape
    err = float(jnp.max(jnp.abs(y - y_ref)))
    assert err < 1e-4, err
    print("KERNEL_OK")
</pallas_src>

<mosaic_0001>
module attributes {stable_mosaic.version = 11 : i64} {
  func.func @kernel(%arg0: i32, %arg1: memref<2x16x16xf32, #tpu.memory_space<vmem>>, %arg2: memref<32x16xf32, #tpu.memory_space<vmem>>, %arg3: memref<16x32xf32, #tpu.memory_space<vmem>>, %arg4: memref<1x32x64xf32, #tpu.memory_space<vmem>>) attributes {dimension_semantics = [#tpu.dimension_semantics<parallel>], iteration_bounds = array<i64: 4>, scalar_prefetch = 0 : i64, scratch_operands = 0 : i64, tpu.core_type = #tpu.core_type<tc>, window_params = [{transform_indices = @transform_0, window_bounds = array<i64: 2, 16, 16>}, {pipeline_mode = #tpu.pipeline_mode<synchronous>, transform_indices = @transform_1, window_bounds = array<i64: 32, 16>}, {pipeline_mode = #tpu.pipeline_mode<synchronous>, transform_indices = @transform_2, window_bounds = array<i64: 16, 32>}, {transform_indices = @transform_3, window_bounds = array<i64: 1, 32, 64>}]} {
    %c0 = arith.constant 0 : index
    %c0_0 = arith.constant 0 : index
    %c0_1 = arith.constant 0 : index
    %0 = vector.load %arg1[%c0, %c0_0, %c0_1] : memref<2x16x16xf32, #tpu.memory_space<vmem>>, vector<2x16x16xf32>
    %1 = vector.shape_cast %0 : vector<2x16x16xf32> to vector<32x16xf32>
    %c0_2 = arith.constant 0 : index
    %c0_3 = arith.constant 0 : index
    %2 = vector.load %arg3[%c0_2, %c0_3] : memref<16x32xf32, #tpu.memory_space<vmem>>, vector<16x32xf32>
    %cst = arith.constant dense<0.000000e+00> : vector<32x32xf32>
    %3 = tpu.matmul %1, %2, %cst {dimension_numbers = #tpu.dot_dimension_numbers<[1], [0], [0], [1], [0, 0, 1, 1], [], []>, precision = #tpu.contract_precision<fp32>} : vector<32x16xf32>, vector<16x32xf32>, vector<32x32xf32> -> vector<32x32xf32>
    %4 = vector.shape_cast %3 : vector<32x32xf32> to vector<2x16x32xf32>
    %5 = tpu.transpose %4, [0, 2, 1] : vector<2x16x32xf32> -> vector<2x32x16xf32>
    %6 = vector.shape_cast %5 : vector<2x32x16xf32> to vector<64x16xf32>
    %c0_4 = arith.constant 0 : index
    %c0_5 = arith.constant 0 : index
    %7 = vector.load %arg2[%c0_4, %c0_5] : memref<32x16xf32, #tpu.memory_space<vmem>>, vector<32x16xf32>
    %cst_6 = arith.constant dense<0.000000e+00> : vector<32x64xf32>
    %8 = tpu.matmul %7, %6, %cst_6 {dimension_numbers = #tpu.dot_dimension_numbers<[1], [1], [0], [0], [0, 0, 1, 0], [], []>, precision = #tpu.contract_precision<fp32>} : vector<32x16xf32>, vector<64x16xf32>, vector<32x64xf32> -> vector<32x64xf32>
    %c0_7 = arith.constant 0 : index
    %c0_8 = arith.constant 0 : index
    %c0_9 = arith.constant 0 : index
    %9 = vector.load %arg4[%c0_7, %c0_8, %c0_9] : memref<1x32x64xf32, #tpu.memory_space<vmem>>, vector<1x32x64xf32>
    %10 = vector.shape_cast %9 : vector<1x32x64xf32> to vector<32x64xf32>
    %11 = vector.shape_cast %8 : vector<32x64xf32> to vector<1x32x64xf32>
    tpu.vector_store %arg4[%c0_7, %c0_8, %c0_9], %11 {strides = array<i32>} : memref<1x32x64xf32, #tpu.memory_space<vmem>>, vector<1x32x64xf32>,
    return
  }
  func.func @transform_0(%arg0: i32) -> (i32, i32, i32) {
    %c0_i32 = arith.constant 0 : i32
    %c0_i32_0 = arith.constant 0 : i32
    %c0_i32_1 = arith.constant 0 : i32
    return %arg0, %c0_i32, %c0_i32_0 : i32, i32, i32
  }
  func.func @transform_1(%arg0: i32) -> (i32, i32) {
    %c0_i32 = arith.constant 0 : i32
    %c0_i32_0 = arith.constant 0 : i32
    %c0_i32_1 = arith.constant 0 : i32
    return %c0_i32, %c0_i32_0 : i32, i32
  }
  func.func @transform_2(%arg0: i32) -> (i32, i32) {
    %c0_i32 = arith.constant 0 : i32
    %c0_i32_0 = arith.constant 0 : i32
    %c0_i32_1 = arith.constant 0 : i32
    return %c0_i32, %c0_i32_0 : i32, i32
  }
  func.func @transform_3(%arg0: i32) -> (i32, i32, i32) {
    %c0_i32 = arith.constant 0 : i32
    %c0_i32_0 = arith.constant 0 : i32
    %c0_i32_1 = arith.constant 0 : i32
    return %arg0, %c0_i32, %c0_i32_0 : i32, i32, i32
  }
}

</mosaic_0001>

<bundles_post_ra>
// kernel: interpolate.1
= control target key start
LH: loop header
LB: loop body
LE: loop exit
PB: predicated region body
PF: predicated region fallthrough
CT: control target
= control target key end

     0   :  { %8 = vsyncpa [#allocation3], 0  ;;  %s1378_s0 = inlined_call_operand.hbm [shape: f32[8,16,16], index: 0, kind: input, shape index: {}]   ;;  %s1379_s1 = inlined_call_operand.vmem [shape: f32[32,16], index: 1, kind: input, shape index: {}]   ;;  %s1380_s2 = inlined_call_operand.vmem [shape: f32[16,32], index: 2, kind: input, shape index: {}]   ;;  %s1381_s3 = inlined_call_operand.vmem [shape: f32[4,32,64], index: 3, kind: output, shape index: {}]  }
   0x1   :  { %10 = vsyncpa [#allocation3 + $0x1], 0  ;;  %s1118_s12 = smov 0   ;;  %s1120_s13 = smov 0  }
   0x2   :  { %s1122_s14 = smov 0   ;;  %s1124_s15 = smov 0  }
   0x3 LB: > { %s1137_s16 = sadd.s32 4294967295, %s1094_s15   ;;  %s1140_s17 = sadd.s32 1, %s1094_s15   ;;  %s1094_s15 = sphi %s1124_s15, %s1388_s15   ;;  %s1090_s14 = sphi %s1122_s14, %s1387_s14   ;;  %s1086_s13 = sphi %s1120_s13, %s1386_s13   ;;  %s1082_s12 = sphi %s1118_s12, %s1385_s12  }
   0x4   : > { %s20_s18 = ssub.s32 %s1094_s15, %s1140_s17  ;;  %s23_s19 = sadd.s32 1, %s1090_s14 }
   0x5   : > { %p21_p0 = scmp.eq.s32.totalorder %s20_s18, 0  ;;  %p30_p1 = scmp.ne.s32.totalorder %s1090_s14, %s1086_s13 }
   0x6   : > { %p31_p2 = scmp.eq.s32.totalorder %s1094_s15, 0  ;;  %p36_p3 = scmp.ne.s32.totalorder %s1086_s13, %s1082_s12 }
   0x7   : > { %s1150_s20 = scalar_select %p21_p0, %s1090_s14, %s23_s19  }
   0x8   : > { %p1152_p4 = por %p31_p2, %p30_p1  ;;  %p37_p5 = scmp.eq.s32.totalorder %s1137_s16, 0 }
   0x9   : > { %p994_p6 = scmp.lt.s32.totalorder %s1094_s15, 4  ;;  %s134_s23 = sand.u32 1, %s1090_s14  }
   0xa   : > { %p1158_p7 = por %p37_p5, %p36_p3  ;;  %s975_s24 = sshll.u32 %s134_s23, 5 }
   0xb   : > { %s986_s25 = sshll.u32 %s1094_s15, 5  ;;  %s138_s29 = scalar_lea.vmem [#allocation2], %s975_s24 }
   0xc   : > { %s144_s28 = scalar_lea.hbm %s1378_s0, %s986_s25  ;;  %s147_s30 = sshll.u32 %s138_s29, 4  ;;  %s148_s30 = int_to_ptr.vmem [resolvable:$true] %s147_s30 }
   0xd   : > { %s145_s4 = sshll.u32 %s144_s28, 4  ;;  %p1169_p8 = pnand %p994_p6, %p1152_p4  ;;  %s146_s4 = int_to_ptr.hbm [resolvable:$true] %s145_s4 }
   0xe   : > { %p979_p9 = scmp.ge.s32.totalorder %s1094_s15, 1  ;;  %s135_s6 = scalar_lea.sflag [#allocation3], %s134_s23 }
   0xf   : > { %s1030_s7 = sshra.s32 %s146_s4, 4  ;;  %p1034_p11 = pneg %p1169_p8  ;;  %s1031_s7 = int_to_ptr.hbm [resolvable:$true] %s1030_s7 }
  0x10   : > { %s1032_s8 = scalar_lea.hbm %s1031_s7, 32  ;;  %s1037_s11 = scalar_lea.hbm %s1378_s0, 128 }
  0x11   : > { %p1033_p10 = scmp.ne.s32.totalorder %s1031_s7, %s1032_s8  ;;  %p1038_p0 = scmp.lt.s32.totalorder %s1031_s7, %s1378_s0 }
  0x12   : > { %p1039_p1 = scmp.lt.s32.totalorder %s1037_s11, %s1032_s8 }
  0x13   : > { %p1035_p12 = pnand %p1034_p11, %p1033_p10 }
  0x14   : > { %p1040_p2 = por %p1039_p1, %p1038_p0 }
  0x15   : > { %p1036_p13 = pneg %p1035_p12 }
  0x17   : > { %p1041_p3 = pnand %p1040_p2, %p1036_p13 }
  0x19   : > { %1044 = shalt.err (!%p1041_p3)
}
  0x1a   : > { %s1096_s19 = smov 128   ;;  %s1097_s21 = smov 8  }
  0x1b   : > { %993 = dma.hbm_to_vmem [thread:$0]  (!%p1169_p8), %s146_s4, 512, %s148_s30, %s135_s6, %s1096_s19, %s1096_s19, %s1097_s21  }
  0x1c   : > { %p155_p4 = scmp.lt.s32.totalorder %s1094_s15, 5 }
  0x1e   : > { %p156_p5 = pnand %p979_p9, %p155_p4 }
  0x1f   : > { %s161_s23 = sand.u32 (!%p156_p5), 1, %s1086_s13  }
  0x20   : > { %159 = sbr.rel (%p156_p5) target bundleno = 651 (0x28b), region = 32  ;;  %s980_s24 = sshll.u32 (!%p156_p5), %s161_s23, 5 }
  0x21   : > { %s162_s25 = scalar_lea.sflag (!%p156_p5), [#allocation3], %s161_s23  ;;  %s1188_s26 = scalar_lea.vmem (!%p156_p5), [#allocation2], %s980_s24 }
  0x25   : > { %1077 = dma.done.wait (%p1158_p7), %s162_s25, 512  }
  0x26   : > { %1079 = vsyncadd (%p1158_p7), %s162_s25, 4294966784  ;;  %vm201_vm0 = vcmask 130048   ;;  %v200_v0 = vld [vmem:[%s1380_s2 + $0x8] sm:$0xff]  ;;  %v199_v1 = vld [vmem:[%s1380_s2] sm:$0xff]  ;;  %p190_p6 = scmp.lt.s32.totalorder %s1137_s16, 3  ;;  %vm900_vm1 = vcmask 523264  }
  0x27   : > { %v195_v2 = vld [vmem:[%s1188_s26] sm:$0xff]  ;;  %v228_v3 = vand.u32 4294901760, %v200_v0  ;;  %v230_v4 = vand.u32 4294901760, %v199_v1  ;;  %v196_v6 = vld [vmem:[%s1188_s26 + $0x8] sm:$0xff]  ;;  %v197_v9 = vld [vmem:[%s1188_s26 + $0x10] sm:$0xff] }
  0x28   : > { %v203_v5 = vsel %vm201_vm0, %v195_v2, 0  ;;  %v206_v8 = vsel %vm201_vm0, %v196_v6, 0  ;;  %v209_v17 = vsel %vm201_vm0, %v197_v9, 0  ;;  %v198_v27 = vld [vmem:[%s1188_s26 + $0x18] sm:$0xff]  ;;  %s1390_s16 = smov (!%p190_p6, %s1137_s16), 3 }
  0x29   : > { %v232_v7 = vand.u32 4294901760, %v203_v5  ;;  %v280_v10 = vsub.f32 %v200_v0, %v228_v3  ;;  %229 = vmatpush.msra.mxu0 %v228_v3  ;;  %v286_v11 = vsub.f32 %v199_v1, %v230_v4  ;;  %364 = vmatpush.msra.mxu3 %v228_v3  ;;  %v240_v12 = vand.u32 4294901760, %v206_v8  ;;  %s987_s10 = sshll.u32 %s1390_s16, 5 }
  0x2a   : > { %v248_v23 = vand.u32 4294901760, %v209_v17  ;;  %v212_v30 = vsel %vm201_vm0, %v198_v27, 0  ;;  %s194_s18 = scalar_lea.vmem %s1381_s3, %s987_s10 }
  0x2b   : > { %v233_v13 = vsub.f32 %v203_v5, %v232_v7  ;;  %324 = vmatpush.msra.mxu2 %v280_v10  ;;  %231 = vmatpush.msra.mxu0 %v230_v4  ;;  %v281_v14 = vand.u32 4294901760, %v280_v10  ;;  %v287_v15 = vand.u32 4294901760, %v286_v11  ;;  %v241_v16 = vsub.f32 %v206_v8, %v240_v12 }
  0x2c   : > { %366 = vmatpush.msra.mxu3 %v230_v4  ;;  %v249_v29 = vsub.f32 %v209_v17, %v248_v23  ;;  %v256_v33 = vand.u32 4294901760, %v212_v30 }
  0x2d   : > { %v234_v18 = vand.u32 4294901760, %v233_v13  ;;  %327 = vmatpush.msra.mxu2 %v286_v11  ;;  %v282_v19 = vsub.f32 %v280_v10, %v281_v14  ;;  %v288_v20 = vsub.f32 %v286_v11, %v287_v15  ;;  %409 = vmatpush.msrb.mxu0 %v281_v14  ;;  %v242_v22 = vand.u32 4294901760, %v241_v16 }
  0x2e   : > { %330 = vmatmul.f32.vlgmr.msra.gmra.mxu2 %v233_v13  ;;  %v250_v32 = vand.u32 4294901760, %v249_v29  ;;  %v257_v35 = vsub.f32 %v212_v30, %v256_v33 }
  0x2f   : > { %v235_v21 = vsub.f32 %v233_v13, %v234_v18  ;;  %370 = vmatmul.f32.vlgmr.msra.gmra.mxu3 %v234_v18  ;;  %v283_v24 = vand.u32 4294901760, %v282_v19  ;;  %v289_v25 = vand.u32 4294901760, %v288_v20  ;;  %413 = vmatpush.msrb.mxu0 %v287_v15  ;;  %v243_v28 = vsub.f32 %v241_v16, %v242_v22 }
  0x30   : > { %v251_v34 = vsub.f32 %v249_v29, %v250_v32  ;;  %v258_v37 = vand.u32 4294901760, %v257_v35 }
  0x31   : > { %v236_v26 = vand.u32 4294901760, %v235_v21  ;;  %284 = vmatpush.msra.mxu1 %v283_v24  ;;  %v244_v31 = vand.u32 4294901760, %v243_v28 }
  0x32   : > { %v252_v36 = vand.u32 4294901760, %v251_v34  ;;  %v259_v38 = vsub.f32 %v257_v35, %v258_v37 }
  0x33   : > { %237 = vmatmul.f32.vlgmr.msra.gmra.mxu0 %v236_v26  ;;  %290 = vmatpush.msra.mxu1 %v289_v25 }
  0x34   : > { %292 = vmatmul.f32.vlgmr.msra.gmra.mxu1 %v232_v7  ;;  %v260_v39 = vand.u32 4294901760, %v259_v38 }
  0x35   : > { %446 = vmatpush.msrb.mxu1 %v228_v3 }
  0x36   : > { %335 = vmatmul.f32.gmra.mxu2 %v241_v16 }
  0x37   : > { %376 = vmatmul.f32.gmra.mxu3 %v242_v22  ;;  %448 = vmatpush.msrb.mxu1 %v230_v4 }
  0x3b   : > { %245 = vmatmul.f32.gmra.mxu0 %v244_v31 }
  0x3c   : > { %296 = vmatmul.f32.gmra.mxu1 %v240_v12 }
  0x3e   : > { %340 = vmatmul.f32.gmra.mxu2 %v249_v29 }
  0x3f   : > { %382 = vmatmul.f32.gmra.mxu3 %v250_v32 }
  0x43   : > { %253 = vmatmul.f32.gmra.mxu0 %v252_v36 }
  0x44   : > { %300 = vmatmul.f32.gmra.mxu1 %v248_v23 }
  0x46   : > { %345 = vmatmul.f32.gmra.mxu2 %v257_v35 }
  0x47   : > { %388 = vmatmul.f32.gmra.mxu3 %v258_v37 }
  0x4b   : > { %261 = vmatmul.f32.gmra.mxu0 %v260_v39 }
  0x4c   : > { %304 = vmatmul.f32.gmra.mxu1 %v256_v33 }
  0x53   : > { %415 = vmatmul.f32.vlgmr.msrb.gmra.mxu0 %v232_v7 }
  0x54   : > { %450 = vmatmul.f32.vlgmr.msrb.gmra.mxu1 %v232_v7 }
  0x5b   : > { %419 = vmatmul.f32.gmra.mxu0 %v240_v12 }
  0x5c   : > { %454 = vmatmul.f32.gmra.mxu1 %v240_v12 }
  0x63   : > { %423 = vmatmul.f32.gmra.mxu0 %v248_v23 }
  0x64   : > { %458 = vmatmul.f32.gmra.mxu1 %v248_v23 }
  0x6b   : > { %427 = vmatmul.f32.gmra.mxu0 %v256_v33 }
  0x6c   : > { %462 = vmatmul.f32.gmra.mxu1 %v256_v33 }
  0xb0   : > { %v238_v40 = vpop.f32.mrf.mxu0 }
  0xb1   : > { %v293_v41 = vpop.f32.mrf.mxu1  ;;  %v331_v45 = vpop.f32.mrf.mxu2 }
  0xb2   : > { %v371_v47 = vpop.f32.mrf.mxu3  ;;  %v294_v48 = vadd.f32 %v293_v41, %v238_v40 }
  0xb4   : > { %v332_v51 = vadd.f32 %v331_v45, %v294_v48  ;;  %v530_v45 = vld [vmem:[%s1379_s1] sm:$0xff] }
  0xb6   : > { %v372_v53 = vadd.f32 %v371_v47, %v332_v51 }
  0xb8   : > { %v246_v42 = vpop.f32.mrf.mxu0 }
  0xb9   : > { %v297_v43 = vpop.f32.mrf.mxu1  ;;  %v336_v52 = vpop.f32.mrf.mxu2 }
  0xba   : > { %v298_v54 = vadd.f32 %v297_v43, %v246_v42  ;;  %v377_v55 = vpop.f32.mrf.mxu3 }
  0xbc   : > { %v337_v59 = vadd.f32 %v336_v52, %v298_v54 }
  0xbe   : > { %v378_v62 = vadd.f32 %v377_v55, %v337_v59 }
  0xc0   : > { %v254_v44 = vpop.f32.mrf.mxu0 }
  0xc1   : > { %v301_v46 = vpop.f32.mrf.mxu1  ;;  %v341_v61 = vpop.f32.mrf.mxu2 }
  0xc2   : > { %v302_v63 = vadd.f32 %v301_v46, %v254_v44  ;;  %v383_v2 = vpop.f32.mrf.mxu3 }
  0xc4   : > { %v342_v4 = vadd.f32 %v341_v61, %v302_v63 }
  0xc6   : > { %v384_v6 = vadd.f32 %v383_v2, %v342_v4 }
  0xc8   : > { %v262_v49 = vpop.f32.mrf.mxu0 }
  0xc9   : > { %v305_v50 = vpop.f32.mrf.mxu1  ;;  %v346_v8 = vpop.f32.mrf.mxu2 }
  0xca   : > { %v306_v7 = vadd.f32 %v305_v50, %v262_v49  ;;  %v389_v14 = vpop.f32.mrf.mxu3  ;;  %v535_v50 = vsel %vm201_vm0, %v530_v45, 0 }
  0xcc   : > { %v347_v12 = vadd.f32 %v346_v8, %v306_v7 }
  0xce   : > { %v390_v15 = vadd.f32 %v389_v14, %v347_v12 }
  0xd0   : > { %v416_v56 = vpop.f32.mrf.mxu0 }
  0xd1   : > { %v417_v57 = vadd.f32 %v416_v56, %v372_v53  ;;  %v451_v58 = vpop.f32.mrf.mxu1 }
  0xd3   : > { %v452_v60 = vadd.f32 %v451_v58, %v417_v57  ;;  %v1268_v57 = vand.u32 4294901760, %v535_v50 }
  0xd5   : > { %466 = vxpose.xlu1.b32.start [1/2] (short) (narrow) %v452_v60, 32  ;;  %v531_v60 = vld [vmem:[%s1379_s1 + $0x8] sm:$0xff] }
  0xd6   : > { %v538_v2 = vsel %vm201_vm0, %v531_v60, 0 }
  0xd8   : > { %v420_v0 = vpop.f32.mrf.mxu0 }
  0xd9   : > { %v421_v1 = vadd.f32 %v420_v0, %v378_v62  ;;  %v455_v3 = vpop.f32.mrf.mxu1 }
  0xdb   : > { %v456_v5 = vadd.f32 %v455_v3, %v421_v1  ;;  %v595_v1 = vsub.f32 %v535_v50, %v1268_v57 }
  0xdd   : > { %467 = vxpose.xlu1.b32.end [2/2] (short) (narrow) %v456_v5, 32  ;;  %v596_v8 = vand.u32 4294901760, %v595_v1 }
  0xe0   : > { %v424_v9 = vpop.f32.mrf.mxu0 }
  0xe1   : > { %v425_v10 = vadd.f32 %v424_v9, %v384_v6  ;;  %v459_v11 = vpop.f32.mrf.mxu1  ;;  %v1300_v9 = vand.u32 4294901760, %v538_v2 }
  0xe3   : > { %v460_v13 = vadd.f32 %v459_v11, %v425_v10  ;;  %v532_v10 = vld [vmem:[%s1379_s1 + $0x10] sm:$0xff] }
  0xe5   : > { %498 = vxpose.xlu0.b32.start [1/2] (short) (narrow) %v460_v13, 32 }
  0xe8   : > { %v428_v16 = vpop.f32.mrf.mxu0 }
  0xe9   : > { %v429_v17 = vadd.f32 %v428_v16, %v390_v15  ;;  %v463_v18 = vpop.f32.mrf.mxu1  ;;  %v597_v15 = vsub.f32 %v595_v1, %v596_v8  ;;  %v603_v16 = vsub.f32 %v538_v2, %v1300_v9 }
  0xeb   : > { %v464_v19 = vadd.f32 %v463_v18, %v429_v17  ;;  %v541_v17 = vsel %vm201_vm0, %v532_v10, 0 }
  0xed   : > { %499 = vxpose.xlu0.b32.end [2/2] (short) (narrow) %v464_v19, 32 }
 0x179   : > { %v482_v20 = vpop.trf.xlu1 }
 0x17a   : > { %v547_v58 = vsel %vm201_vm0, %v482_v20, 0 }
 0x17b   : > { %v1289_v3 = vand.u32 4294901760, %v547_v58 }
 0x17d   : > { %v1308_v11 = vsub.f32 %v547_v58, %v1289_v3 }
 0x17f   : > { %v679_v20 = vand.u32 4294901760, %v1308_v11 }
 0x181   : > { %v483_v23 = vpop.trf.xlu1 }
 0x182   : > { %v550_v51 = vsel %vm201_vm0, %v483_v23, 0  ;;  %v610_v23 = vand.u32 4294901760, %v541_v17 }
 0x183   : > { %v1272_v59 = vand.u32 4294901760, %v550_v51 }
 0x185   : > { %v1293_v4 = vsub.f32 %v550_v51, %v1272_v59 }
 0x187   : > { %v673_v14 = vand.u32 4294901760, %v1293_v4 }
 0x189   : > { %v514_v21 = vpop.trf.xlu0  ;;  %v484_v25 = vpop.trf.xlu1  ;;  %v674_v19 = vsub.f32 %v1293_v4, %v673_v14 }
 0x18a   : > { %v559_v31 = vsel %vm201_vm0, %v514_v21, 0  ;;  %v553_v44 = vsel %vm201_vm0, %v484_v25, 0  ;;  %v598_v21 = vand.u32 4294901760, %v597_v15 }
 0x18b   : > { %v1226_v37 = vand.u32 4294901760, %v559_v31  ;;  %v1257_v52 = vand.u32 4294901760, %v553_v44  ;;  %v675_v25 = vand.u32 4294901760, %v674_v19 }
 0x18d   : > { %v1241_v43 = vsub.f32 %v559_v31, %v1226_v37  ;;  %v1279_v61 = vsub.f32 %v553_v44, %v1257_v52 }
 0x18f   : > { %v655_v56 = vand.u32 4294901760, %v1241_v43  ;;  %v667_v7 = vand.u32 4294901760, %v1279_v61 }
 0x191   : > { %v515_v22 = vpop.trf.xlu0  ;;  %v485_v36 = vpop.trf.xlu1  ;;  %v656_v63 = vsub.f32 %v1241_v43, %v655_v56  ;;  %v668_v13 = vsub.f32 %v1279_v61, %v667_v7 }
 0x192   : > { %v562_v28 = vsel %vm201_vm0, %v515_v22, 0  ;;  %v556_v41 = vsel %vm201_vm0, %v485_v36, 0  ;;  %v604_v22 = vand.u32 4294901760, %v603_v16 }
 0x193   : > { %v1214_v32 = vand.u32 4294901760, %v562_v28  ;;  %v1248_v46 = vand.u32 4294901760, %v556_v41  ;;  %v657_v5 = vand.u32 4294901760, %v656_v63  ;;  %v669_v18 = vand.u32 4294901760, %v668_v13 }
 0x195   : > { %v1229_v38 = vsub.f32 %v562_v28, %v1214_v32  ;;  %v1261_v53 = vsub.f32 %v556_v41, %v1248_v46  ;;  %v605_v28 = vsub.f32 %v603_v16, %v604_v22 }
 0x197   : > { %v649_v49 = vand.u32 4294901760, %v1229_v38  ;;  %v661_v0 = vand.u32 4294901760, %v1261_v53 }
 0x199   : > { %v516_v24 = vpop.trf.xlu0  ;;  %v650_v55 = vsub.f32 %v1229_v38, %v649_v49  ;;  %v662_v6 = vsub.f32 %v1261_v53, %v661_v0 }
 0x19a   : > { %v565_v26 = vsel %vm201_vm0, %v516_v24, 0  ;;  %v533_v24 = vld [vmem:[%s1379_s1 + $0x18] sm:$0xff] }
 0x19b   : > { %v1209_v27 = vand.u32 4294901760, %v565_v26  ;;  %v651_v62 = vand.u32 4294901760, %v650_v55  ;;  %v663_v12 = vand.u32 4294901760, %v662_v6 }
 0x19d   : > { %v1217_v33 = vsub.f32 %v565_v26, %v1209_v27  ;;  %v680_v26 = vsub.f32 %v1308_v11, %v679_v20 }
 0x19f   : > { %v643_v40 = vand.u32 4294901760, %v1217_v33  ;;  %v681_v31 = vand.u32 4294901760, %v680_v26 }
 0x1a1   : > { %v517_v29 = vpop.trf.xlu0  ;;  %v644_v48 = vsub.f32 %v1217_v33, %v643_v40 }
 0x1a2   : > { %v568_v30 = vsel %vm201_vm0, %v517_v29, 0  ;;  %v611_v29 = vsub.f32 %v541_v17, %v610_v23 }
 0x1a3   : > { %v1219_v34 = vand.u32 4294901760, %v568_v30  ;;  %v645_v54 = vand.u32 4294901760, %v644_v48 }
 0x1a4   : > { %v612_v36 = vand.u32 4294901760, %v611_v29 }
 0x1a5   : > { %v1222_v35 = vsub.f32 %v568_v30, %v1219_v34  ;;  %579 = vmatpush.xpose.msrb.mxu2 %v1219_v34  ;;  %762 = vmatpush.xpose.msra.mxu1 %v1219_v34  ;;  %v544_v30 = vsel %vm201_vm0, %v533_v24, 0 }
 0x1a6   : > { %v613_v41 = vsub.f32 %v611_v29, %v612_v36 }
 0x1a7   : > { %710 = vmatpush.xpose.msra.mxu0 %v1222_v35  ;;  %v637_v39 = vand.u32 4294901760, %v1222_v35 }
 0x1a9   : > { %581 = vmatpush.xpose.msrb.mxu2 %v1209_v27  ;;  %764 = vmatpush.xpose.msra.mxu1 %v1209_v27  ;;  %v638_v42 = vsub.f32 %v1222_v35, %v637_v39  ;;  %v606_v35 = vand.u32 4294901760, %v605_v28 }
 0x1ab   : > { %713 = vmatpush.xpose.msra.mxu0 %v1217_v33  ;;  %v639_v47 = vand.u32 4294901760, %v638_v42  ;;  %v614_v33 = vand.u32 4294901760, %v613_v41 }
 0x1ad   : > { %583 = vmatpush.xpose.msrb.mxu2 %v1214_v32  ;;  %640 = vmatpush.xpose.msrb.mxu3 %v639_v47 }
 0x1ae   : > { %766 = vmatpush.xpose.msra.mxu1 %v1214_v32 }
 0x1af   : > { %716 = vmatpush.xpose.msra.mxu0 %v1229_v38 }
 0x1b1   : > { %585 = vmatpush.xpose.msrb.mxu2 %v1226_v37  ;;  %646 = vmatpush.xpose.msrb.mxu3 %v645_v54 }
 0x1b2   : > { %768 = vmatpush.xpose.msra.mxu1 %v1226_v37 }
 0x1b3   : > { %719 = vmatpush.xpose.msra.mxu0 %v1241_v43 }
 0x1b5   : > { %587 = vmatpush.xpose.msrb.mxu2 %v1248_v46  ;;  %652 = vmatpush.xpose.msrb.mxu3 %v651_v62 }
 0x1b6   : > { %770 = vmatpush.xpose.msra.mxu1 %v1248_v46 }
 0x1b7   : > { %722 = vmatpush.xpose.msra.mxu0 %v1261_v53 }
 0x1b9   : > { %589 = vmatpush.xpose.msrb.mxu2 %v1257_v52  ;;  %658 = vmatpush.xpose.msrb.mxu3 %v657_v5 }
 0x1ba   : > { %772 = vmatpush.xpose.msra.mxu1 %v1257_v52 }
 0x1bb   : > { %725 = vmatpush.xpose.msra.mxu0 %v1279_v61 }
 0x1bd   : > { %591 = vmatpush.xpose.msrb.mxu2 %v1272_v59  ;;  %664 = vmatpush.xpose.msrb.mxu3 %v663_v12 }
 0x1be   : > { %774 = vmatpush.xpose.msra.mxu1 %v1272_v59 }
 0x1bf   : > { %728 = vmatpush.xpose.msra.mxu0 %v1293_v4 }
 0x1c1   : > { %593 = vmatpush.xpose.msrb.mxu2 %v1289_v3  ;;  %670 = vmatpush.xpose.msrb.mxu3 %v669_v18 }
 0x1c2   : > { %776 = vmatpush.xpose.msra.mxu1 %v1289_v3 }
 0x1c3   : > { %731 = vmatpush.xpose.msra.mxu0 %v1308_v11 }
 0x1c4   : > { %599 = vmatmul.f32.vlgmr.msrb.gmra.mxu2 %v598_v21 }
 0x1c5   : > { %813 = vmatpush.xpose.msra.mxu2 %v637_v39  ;;  %676 = vmatpush.xpose.msrb.mxu3 %v675_v25  ;;  %v618_v39 = vand.u32 4294901760, %v544_v30 }
 0x1c6   : > { %780 = vmatmul.f32.vlgmr.msra.gmra.mxu1 %v596_v8  ;;  %734 = vmatmul.f32.vlgmr.msra.gmra.mxu0 %v595_v1 }
 0x1c7   : > { %v619_v42 = vsub.f32 %v544_v30, %v618_v39 }
 0x1c9   : > { %817 = vmatpush.xpose.msra.mxu2 %v643_v40  ;;  %682 = vmatpush.xpose.msrb.mxu3 %v681_v31  ;;  %v620_v40 = vand.u32 4294901760, %v619_v42 }
 0x1cc   : > { %607 = vmatmul.f32.gmra.mxu2 %v606_v35  ;;  %684 = vmatmul.f32.vlgmr.msrb.gmra.mxu3 %v1268_v57 }
 0x1cd   : > { %821 = vmatpush.xpose.msra.mxu2 %v649_v49  ;;  %868 = vmatpush.xpose.msra.mxu3 %v1219_v34  ;;  %v621_v34 = vsub.f32 %v619_v42, %v620_v40 }
 0x1ce   : > { %786 = vmatmul.f32.gmra.mxu1 %v604_v22  ;;  %739 = vmatmul.f32.gmra.mxu0 %v603_v16 }
 0x1d1   : > { %825 = vmatpush.xpose.msra.mxu2 %v655_v56  ;;  %870 = vmatpush.xpose.msra.mxu3 %v1209_v27  ;;  %v622_v27 = vand.u32 4294901760, %v621_v34 }
 0x1d4   : > { %615 = vmatmul.f32.gmra.mxu2 %v614_v33  ;;  %688 = vmatmul.f32.gmra.mxu3 %v1300_v9 }
 0x1d5   : > { %829 = vmatpush.xpose.msra.mxu2 %v661_v0  ;;  %872 = vmatpush.xpose.msra.mxu3 %v1214_v32 }
 0x1d6   : > { %792 = vmatmul.f32.gmra.mxu1 %v612_v36  ;;  %744 = vmatmul.f32.gmra.mxu0 %v611_v29 }
 0x1d9   : > { %833 = vmatpush.xpose.msra.mxu2 %v667_v7  ;;  %874 = vmatpush.xpose.msra.mxu3 %v1226_v37 }
 0x1dc   : > { %623 = vmatmul.f32.gmra.mxu2 %v622_v27  ;;  %692 = vmatmul.f32.gmra.mxu3 %v610_v23 }
 0x1dd   : > { %837 = vmatpush.xpose.msra.mxu2 %v673_v14  ;;  %876 = vmatpush.xpose.msra.mxu3 %v1248_v46 }
 0x1de   : > { %798 = vmatmul.f32.gmra.mxu1 %v620_v40  ;;  %749 = vmatmul.f32.gmra.mxu0 %v619_v42 }
 0x1e1   : > { %841 = vmatpush.xpose.msra.mxu2 %v679_v20  ;;  %878 = vmatpush.xpose.msra.mxu3 %v1257_v52 }
 0x1e4   : > { %696 = vmatmul.f32.gmra.mxu3 %v618_v39  ;;  %843 = vmatmul.f32.vlgmr.msra.gmra.mxu2 %v1268_v57 }
 0x1e5   : > { %880 = vmatpush.xpose.msra.mxu3 %v1272_v59 }
 0x1e9   : > { %882 = vmatpush.xpose.msra.mxu3 %v1289_v3 }
 0x1ec   : > { %847 = vmatmul.f32.gmra.mxu2 %v1300_v9  ;;  %884 = vmatmul.f32.vlgmr.msra.gmra.mxu3 %v1268_v57 }
 0x1f4   : > { %851 = vmatmul.f32.gmra.mxu2 %v610_v23  ;;  %888 = vmatmul.f32.gmra.mxu3 %v1300_v9 }
 0x1fc   : > { %855 = vmatmul.f32.gmra.mxu2 %v618_v39  ;;  %892 = vmatmul.f32.gmra.mxu3 %v610_v23 }
 0x204   : > { %896 = vmatmul.f32.gmra.mxu3 %v618_v39 }
 0x243   : > { %v735_v45 = vpop.f32.mrf.mxu0  ;;  %v781_v48 = vpop.f32.mrf.mxu1 }
 0x247   : > { %v600_v32 = vpop.f32.mrf.mxu2 }
 0x24b   : > { %v740_v53 = vpop.f32.mrf.mxu0  ;;  %v787_v56 = vpop.f32.mrf.mxu1 }
 0x24f   : > { %v608_v37 = vpop.f32.mrf.mxu2  ;;  %v685_v38 = vpop.f32.mrf.mxu3 }
 0x250   : > { %v686_v49 = vadd.f32 %v685_v38, %v600_v32 }
 0x252   : > { %v736_v52 = vadd.f32 %v735_v45, %v686_v49 }
 0x253   : > { %v745_v62 = vpop.f32.mrf.mxu0  ;;  %v793_v2 = vpop.f32.mrf.mxu1 }
 0x254   : > { %v782_v54 = vadd.f32 %v781_v48, %v736_v52 }
 0x257   : > { %v616_v43 = vpop.f32.mrf.mxu2  ;;  %v689_v44 = vpop.f32.mrf.mxu3 }
 0x258   : > { %v690_v55 = vadd.f32 %v689_v44, %v608_v37 }
 0x25a   : > { %v741_v60 = vadd.f32 %v740_v53, %v690_v55 }
 0x25b   : > { %v750_v9 = vpop.f32.mrf.mxu0  ;;  %v799_v14 = vpop.f32.mrf.mxu1 }
 0x25c   : > { %v788_v63 = vadd.f32 %v787_v56, %v741_v60 }
 0x25f   : > { %v624_v46 = vpop.f32.mrf.mxu2  ;;  %v693_v47 = vpop.f32.mrf.mxu3 }
 0x260   : > { %v694_v0 = vadd.f32 %v693_v47, %v616_v43 }
 0x262   : > { %v746_v4 = vadd.f32 %v745_v62, %v694_v0 }
 0x264   : > { %v794_v7 = vadd.f32 %v793_v2, %v746_v4 }
 0x267   : > { %v697_v50 = vpop.f32.mrf.mxu3  ;;  %v844_v51 = vpop.f32.mrf.mxu2 }
 0x268   : > { %v845_v57 = vadd.f32 %v844_v51, %v782_v54  ;;  %v698_v8 = vadd.f32 %v697_v50, %v624_v46 }
 0x26a   : > { %v751_v12 = vadd.f32 %v750_v9, %v698_v8 }
 0x26c   : > { %v800_v16 = vadd.f32 %v799_v14, %v751_v12 }
 0x26f   : > { %v848_v58 = vpop.f32.mrf.mxu2  ;;  %v885_v59 = vpop.f32.mrf.mxu3 }
 0x270   : > { %v886_v61 = vadd.f32 %v885_v59, %v845_v57  ;;  %v849_v1 = vadd.f32 %v848_v58, %v788_v63 }
 0x272   : > { %901 = vst.msk [vmem:[%s194_s18] sm:$0xff] %vm900_vm1, %v886_v61 }
 0x277   : > { %v889_v3 = vpop.f32.mrf.mxu3  ;;  %v852_v6 = vpop.f32.mrf.mxu2 }
 0x278   : > { %v890_v5 = vadd.f32 %v889_v3, %v849_v1  ;;  %v853_v10 = vadd.f32 %v852_v6, %v794_v7 }
 0x27a   : > { %902 = vst.msk [vmem:[%s194_s18 + $0x8] sm:$0xff] %vm900_vm1, %v890_v5 }
 0x27f   : > { %v893_v11 = vpop.f32.mrf.mxu3  ;;  %v856_v15 = vpop.f32.mrf.mxu2 }
 0x280   : > { %v894_v13 = vadd.f32 %v893_v11, %v853_v10  ;;  %v857_v17 = vadd.f32 %v856_v15, %v800_v16 }
 0x282   : > { %903 = vst.msk [vmem:[%s194_s18 + $0x10] sm:$0xff] %vm900_vm1, %v894_v13 }
 0x287   : > { %v897_v18 = vpop.f32.mrf.mxu3 }
 0x288   : > { %v898_v19 = vadd.f32 %v897_v18, %v857_v17 }
 0x28a   : > { %904 = vst.msk [vmem:[%s194_s18 + $0x18] sm:$0xff] %vm900_vm1, %v898_v19 }
 0x28b PF: > { %p13_p7 = scmp.ge.s32.totalorder %s1140_s17, 6   ;;  %s1385_s12 = smov %s1086_s13 }
 0x28c   : > { %s1386_s13 = smov %s1090_s14  ;;  %s1387_s14 = smov %s1150_s20 }
 0x28d   : > { %s1388_s15 = smov %s1140_s17  ;;  %15 = sbr.rel (!%p13_p7) target bundleno = 3 (0x3), region = 72 }
 0x292   :  { %926 = vsyncpa [#allocation3], 1 }
 0x293   :  { %928 = vsyncpa [#allocation3 + $0x1], 1 }

</bundles_post_ra>
